<compile_context>
chip_gen: v5e
topology: v5e:2x2
jax: 0.10.0
libtpu: 0.0.40
codegen_flags: <defaults>
</compile_context>

<pallas_src>
import functools

import jax
import jax.numpy as jnp
from jax.experimental import pallas as pl
from jax.experimental.pallas import tpu as pltpu

LANE = 128


def _round_up(x, m):
    return (x + m - 1) // m * m


def combo_classifier_kernel(
    x_ref,    # [TB*T, Fp]   flattened feature rows   (bf16)
    txt_ref,  # [TB*T, Ep]   flattened text rows      (bf16)
    mw_ref,   # [TB, T]      normalized mask weights  (f32) = mask / max(sum(mask), 1)
    wf_ref,   # [Fp, Hp]     feat encoder weight      (bf16, zero-padded)
    bf_ref,   # [1, Hp]      (f32)
    wt_ref,   # [Ep, Hp]     text encoder weight      (bf16, zero-padded)
    bt_ref,   # [1, Hp]      (f32)
    wp_ref,   # [2*Hp, TAGp] fused projection weight  (bf16, [wpf ; 0 ; wpt ; 0])
    bp_ref,   # [1, TAGp]    (f32)
    out_ref,  # [TB, TAGp]   logits (f32)
    *, tb, t,
):
    hp = wf_ref.shape[-1]

    # --- per-timestep encoders: bf16 MXU matmuls, f32 accumulation, f32 tanh ---
    feat_h = jnp.tanh(
        jnp.dot(x_ref[...], wf_ref[...], preferred_element_type=jnp.float32)
        + bf_ref[...]
    )  # [TB*T, Hp] f32
    text_h = jnp.tanh(
        jnp.dot(txt_ref[...], wt_ref[...], preferred_element_type=jnp.float32)
        + bt_ref[...]
    )  # [TB*T, Hp] f32

    # --- masked mean over time: weights already normalized in the wrapper, so this
    #     is a single weighted sublane reduction (no divides in-kernel) ---
    w = mw_ref[...][:, :, None]                                   # [TB, T, 1]
    feat_enc = jnp.sum(feat_h.reshape(tb, t, hp) * w, axis=1)     # [TB, Hp]
    text_enc = jnp.sum(text_h.reshape(tb, t, hp) * w, axis=1)     # [TB, Hp]

    # --- fused projection: one MXU dot over the concatenated encoding ---
    enc = jnp.concatenate([feat_enc, text_enc], axis=-1).astype(wp_ref.dtype)
    logits = (
        jnp.dot(enc, wp_ref[...], preferred_element_type=jnp.float32) + bp_ref[...]
    )  # [TB, TAGp]
    out_ref[...] = logits.astype(out_ref.dtype)


def combo_classifier_forward(x, txt, seq_mask, params, *, batch_tile=8,
                             compute_dtype=jnp.bfloat16):
    """Pads to lane-dense 128-multiple shapes, grids over batch, slices logits back."""
    f32 = jnp.float32
    B, T, F = x.shape
    E = txt.shape[-1]
    H = params["wf"].shape[-1]
    TAG = params["bp"].shape[-1]

    Fp = _round_up(F, LANE)
    Ep = _round_up(E, LANE)
    Hp = _round_up(H, LANE)
    TAGp = _round_up(TAG, LANE)
    TB = batch_tile
    Bp = _round_up(max(B, TB), TB)
    nb = Bp // TB

    # ---- layout plumbing in JAX (zero-pad lanes/batch, flatten (B,T,.) -> (B*T,.)) ----
    xp = jnp.zeros((Bp, T, Fp), f32).at[:B, :, :F].set(x).reshape(Bp * T, Fp)
    tp = jnp.zeros((Bp, T, Ep), f32).at[:B, :, :E].set(txt).reshape(Bp * T, Ep)
    xp = xp.astype(compute_dtype)
    tp = tp.astype(compute_dtype)

    # normalized mask weights: mask / max(sum(mask), 1)  (NaN guard for empty rows)
    denom = jnp.maximum(jnp.sum(seq_mask, axis=1, keepdims=True), 1.0)
    mwp = jnp.zeros((Bp, T), f32).at[:B].set((seq_mask / denom).astype(f32))

    # zero-padded weights: padded rows/cols contribute exactly 0 to every result
    wf = jnp.zeros((Fp, Hp), f32).at[:F, :H].set(params["wf"]).astype(compute_dtype)
    wt = jnp.zeros((Ep, Hp), f32).at[:E, :H].set(params["wt"]).astype(compute_dtype)
    bf = jnp.zeros((1, Hp), f32).at[:, :H].set(params["bf"])
    bt = jnp.zeros((1, Hp), f32).at[:, :H].set(params["bt"])
    wp = (jnp.zeros((2 * Hp, TAGp), f32)
          .at[:H, :TAG].set(params["wpf"])
          .at[Hp:Hp + H, :TAG].set(params["wpt"])
          .astype(compute_dtype))
    bp = jnp.zeros((1, TAGp), f32).at[:, :TAG].set(params["bp"])

    kernel = functools.partial(combo_classifier_kernel, tb=TB, t=T)

    itm = jnp.dtype(compute_dtype).itemsize
    flops = 2 * Bp * T * (Fp + Ep) * Hp + 2 * Bp * (2 * Hp) * TAGp
    transcendentals = 2 * Bp * T * Hp
    bytes_accessed = (
        (xp.size + tp.size + wf.size + wt.size + wp.size) * itm
        + (mwp.size + bf.size + bt.size + bp.size + Bp * TAGp) * 4
    )

    out_padded = pl.pallas_call(
        kernel,
        out_shape=jax.ShapeDtypeStruct((Bp, TAGp), f32),
        grid=(nb,),
        in_specs=[
            pl.BlockSpec((TB * T, Fp), lambda b: (b, 0)),      # x rows
            pl.BlockSpec((TB * T, Ep), lambda b: (b, 0)),      # txt rows
            pl.BlockSpec((TB, T), lambda b: (b, 0)),           # mask weights
            pl.BlockSpec((Fp, Hp), lambda b: (0, 0)),          # wf (resident)
            pl.BlockSpec((1, Hp), lambda b: (0, 0)),           # bf
            pl.BlockSpec((Ep, Hp), lambda b: (0, 0)),          # wt
            pl.BlockSpec((1, Hp), lambda b: (0, 0)),           # bt
            pl.BlockSpec((2 * Hp, TAGp), lambda b: (0, 0)),    # wp
            pl.BlockSpec((1, TAGp), lambda b: (0, 0)),         # bp
        ],
        out_specs=pl.BlockSpec((TB, TAGp), lambda b: (b, 0)),
        compiler_params=pltpu.CompilerParams(
            dimension_semantics=("parallel",),
            vmem_limit_bytes=48 * 1024 * 1024,
        ),
        cost_estimate=pl.CostEstimate(
            flops=flops,
            transcendentals=transcendentals,
            bytes_accessed=bytes_accessed,
        ),
    )(xp, tp, mwp, wf, bf, wt, bt, wp, bp)

    return out_padded[:B, :TAG]


def reference_forward(x, txt, seq_mask, params, compute_dtype=jnp.bfloat16):
    """Pure-JAX reference with the same bf16-matmul / f32-accumulation recipe."""
    f32 = jnp.float32
    cd = compute_dtype
    feat_h = jnp.tanh(
        jnp.einsum("btf,fh->bth", x.astype(cd), params["wf"].astype(cd),
                   preferred_element_type=f32) + params["bf"])
    text_h = jnp.tanh(
        jnp.einsum("bte,eh->bth", txt.astype(cd), params["wt"].astype(cd),
                   preferred_element_type=f32) + params["bt"])
    denom = jnp.maximum(jnp.sum(seq_mask, axis=1, keepdims=True), 1.0)
    w = (seq_mask / denom)[:, :, None]
    feat_enc = jnp.sum(feat_h * w, axis=1)
    text_enc = jnp.sum(text_h * w, axis=1)
    enc = jnp.concatenate([feat_enc, text_enc], axis=-1).astype(cd)
    wp = jnp.concatenate([params["wpf"], params["wpt"]], axis=0).astype(cd)
    return jnp.dot(enc, wp, preferred_element_type=f32) + params["bp"]


def make_params(key, feat_size, emb_size, hidden_size, tag_size):
    ks = jax.random.split(key, 6)
    scale = 0.1
    wf = scale * jax.random.normal(ks[0], (feat_size, hidden_size), jnp.float32)
    bf = scale * jax.random.normal(ks[1], (1, hidden_size), jnp.float32)
    wt = scale * jax.random.normal(ks[2], (emb_size, hidden_size), jnp.float32)
    bt = scale * jax.random.normal(ks[3], (1, hidden_size), jnp.float32)
    # projection over encoding_size = 2 * hidden_size, stored split (feat half / text half)
    wp = scale * jax.random.normal(ks[4], (2 * hidden_size, tag_size), jnp.float32)
    bp = scale * jax.random.normal(ks[5], (1, tag_size), jnp.float32)
    return {
        "wf": wf, "bf": bf,
        "wt": wt, "bt": bt,
        "wpf": wp[:hidden_size], "wpt": wp[hidden_size:], "bp": bp,
    }


if __name__ == "__main__":
    B, T = 16, 8
    feat_size, emb_size, hidden_size, tag_size = 16, 32, 32, 4

    key = jax.random.PRNGKey(0)
    k_x, k_t, k_l, k_p = jax.random.split(key, 4)

    x = jax.random.normal(k_x, (B, T, feat_size), jnp.float32)
    txt = jax.random.normal(k_t, (B, T, emb_size), jnp.float32)
    seq_len = jax.random.randint(k_l, (B,), 1, T + 1)
    seq_mask = (jnp.arange(T)[None, :] < seq_len[:, None]).astype(jnp.float32)  # [B, T]

    params = make_params(k_p, feat_size, emb_size, hidden_size, tag_size)

    out = combo_classifier_forward(x, txt, seq_mask, params, batch_tile=8)
    out = jax.block_until_ready(out)

    ref = reference_forward(x, txt, seq_mask, params)
    assert out.shape == (B, tag_size)
    max_err = float(jnp.max(jnp.abs(out - ref)))
    assert jnp.allclose(out, ref, atol=1e-3, rtol=1e-3), f"mismatch vs reference: {max_err}"
    print("KERNEL_OK")
</pallas_src>

<mosaic_0001>
module attributes {stable_mosaic.version = 11 : i64} {
  func.func @combo_classifier_kernel(%arg0: i32, %arg1: memref<64x128xbf16, #tpu.memory_space<vmem>>, %arg2: memref<64x128xbf16, #tpu.memory_space<vmem>>, %arg3: memref<8x8xf32, #tpu.memory_space<vmem>>, %arg4: memref<128x128xbf16, #tpu.memory_space<vmem>>, %arg5: memref<1x128xf32, #tpu.memory_space<vmem>>, %arg6: memref<128x128xbf16, #tpu.memory_space<vmem>>, %arg7: memref<1x128xf32, #tpu.memory_space<vmem>>, %arg8: memref<256x128xbf16, #tpu.memory_space<vmem>>, %arg9: memref<1x128xf32, #tpu.memory_space<vmem>>, %arg10: memref<8x128xf32, #tpu.memory_space<vmem>>) attributes {dimension_semantics = [#tpu.dimension_semantics<parallel>], iteration_bounds = array<i64: 2>, scalar_prefetch = 0 : i64, scratch_operands = 0 : i64, tpu.core_type = #tpu.core_type<tc>, window_params = [{transform_indices = @transform_0, window_bounds = array<i64: 64, 128>}, {transform_indices = @transform_1, window_bounds = array<i64: 64, 128>}, {transform_indices = @transform_2, window_bounds = array<i64: 8, 8>}, {pipeline_mode = #tpu.pipeline_mode<synchronous>, transform_indices = @transform_3, window_bounds = array<i64: 128, 128>}, {pipeline_mode = #tpu.pipeline_mode<synchronous>, transform_indices = @transform_4, window_bounds = array<i64: 1, 128>}, {pipeline_mode = #tpu.pipeline_mode<synchronous>, transform_indices = @transform_5, window_bounds = array<i64: 128, 128>}, {pipeline_mode = #tpu.pipeline_mode<synchronous>, transform_indices = @transform_6, window_bounds = array<i64: 1, 128>}, {pipeline_mode = #tpu.pipeline_mode<synchronous>, transform_indices = @transform_7, window_bounds = array<i64: 256, 128>}, {pipeline_mode = #tpu.pipeline_mode<synchronous>, transform_indices = @transform_8, window_bounds = array<i64: 1, 128>}, {transform_indices = @transform_9, window_bounds = array<i64: 8, 128>}]} {
    %c0 = arith.constant 0 : index
    %c0_0 = arith.constant 0 : index
    %0 = vector.load %arg1[%c0, %c0_0] : memref<64x128xbf16, #tpu.memory_space<vmem>>, vector<64x128xbf16>
    %c0_1 = arith.constant 0 : index
    %c0_2 = arith.constant 0 : index
    %1 = vector.load %arg4[%c0_1, %c0_2] : memref<128x128xbf16, #tpu.memory_space<vmem>>, vector<128x128xbf16>
    %cst = arith.constant dense<0.000000e+00> : vector<64x128xf32>
    %2 = tpu.matmul %0, %1, %cst {dimension_numbers = #tpu.dot_dimension_numbers<[1], [0], [0], [1], [0, 0, 1, 1], [], []>} : vector<64x128xbf16>, vector<128x128xbf16>, vector<64x128xf32> -> vector<64x128xf32>
    %c0_3 = arith.constant 0 : index
    %c0_4 = arith.constant 0 : index
    %3 = vector.load %arg5[%c0_3, %c0_4] : memref<1x128xf32, #tpu.memory_space<vmem>>, vector<1x128xf32>
    %4 = vector.broadcast %3 : vector<1x128xf32> to vector<64x128xf32>
    %5 = arith.addf %2, %4 : vector<64x128xf32>
    %6 = math.tanh %5 : vector<64x128xf32>
    %c0_5 = arith.constant 0 : index
    %c0_6 = arith.constant 0 : index
    %7 = vector.load %arg2[%c0_5, %c0_6] : memref<64x128xbf16, #tpu.memory_space<vmem>>, vector<64x128xbf16>
    %c0_7 = arith.constant 0 : index
    %c0_8 = arith.constant 0 : index
    %8 = vector.load %arg6[%c0_7, %c0_8] : memref<128x128xbf16, #tpu.memory_space<vmem>>, vector<128x128xbf16>
    %cst_9 = arith.constant dense<0.000000e+00> : vector<64x128xf32>
    %9 = tpu.matmul %7, %8, %cst_9 {dimension_numbers = #tpu.dot_dimension_numbers<[1], [0], [0], [1], [0, 0, 1, 1], [], []>} : vector<64x128xbf16>, vector<128x128xbf16>, vector<64x128xf32> -> vector<64x128xf32>
    %c0_10 = arith.constant 0 : index
    %c0_11 = arith.constant 0 : index
    %10 = vector.load %arg7[%c0_10, %c0_11] : memref<1x128xf32, #tpu.memory_space<vmem>>, vector<1x128xf32>
    %11 = vector.broadcast %10 : vector<1x128xf32> to vector<64x128xf32>
    %12 = arith.addf %9, %11 : vector<64x128xf32>
    %13 = math.tanh %12 : vector<64x128xf32>
    %c0_12 = arith.constant 0 : index
    %c0_13 = arith.constant 0 : index
    %14 = vector.load %arg3[%c0_12, %c0_13] : memref<8x8xf32, #tpu.memory_space<vmem>>, vector<8x8xf32>
    %15 = vector.shape_cast %14 : vector<8x8xf32> to vector<8x8x1xf32>
    %16 = vector.shape_cast %6 : vector<64x128xf32> to vector<8x8x128xf32>
    %17 = vector.broadcast %15 : vector<8x8x1xf32> to vector<8x8x128xf32>
    %18 = arith.mulf %16, %17 : vector<8x8x128xf32>
    %cst_14 = arith.constant dense<0.000000e+00> : vector<8x128xf32>
    %19 = vector.multi_reduction <add>, %18, %cst_14 [1] : vector<8x8x128xf32> to vector<8x128xf32>
    %20 = vector.shape_cast %13 : vector<64x128xf32> to vector<8x8x128xf32>
    %21 = vector.broadcast %15 : vector<8x8x1xf32> to vector<8x8x128xf32>
    %22 = arith.mulf %20, %21 : vector<8x8x128xf32>
    %cst_15 = arith.constant dense<0.000000e+00> : vector<8x128xf32>
    %23 = vector.multi_reduction <add>, %22, %cst_15 [1] : vector<8x8x128xf32> to vector<8x128xf32>
    %24 = tpu.concatenate %19, %23 in 1 : vector<8x128xf32>, vector<8x128xf32> -> vector<8x256xf32>
    %25 = arith.truncf %24 : vector<8x256xf32> to vector<8x256xbf16>
    %c0_16 = arith.constant 0 : index
    %c0_17 = arith.constant 0 : index
    %26 = vector.load %arg8[%c0_16, %c0_17] : memref<256x128xbf16, #tpu.memory_space<vmem>>, vector<256x128xbf16>
    %cst_18 = arith.constant dense<0.000000e+00> : vector<8x128xf32>
    %27 = tpu.matmul %25, %26, %cst_18 {dimension_numbers = #tpu.dot_dimension_numbers<[1], [0], [0], [1], [0, 0, 1, 1], [], []>} : vector<8x256xbf16>, vector<256x128xbf16>, vector<8x128xf32> -> vector<8x128xf32>
    %c0_19 = arith.constant 0 : index
    %c0_20 = arith.constant 0 : index
    %28 = vector.load %arg9[%c0_19, %c0_20] : memref<1x128xf32, #tpu.memory_space<vmem>>, vector<1x128xf32>
    %29 = vector.broadcast %28 : vector<1x128xf32> to vector<8x128xf32>
    %30 = arith.addf %27, %29 : vector<8x128xf32>
    %c0_21 = arith.constant 0 : index
    %c0_22 = arith.constant 0 : index
    %31 = vector.load %arg10[%c0_21, %c0_22] : memref<8x128xf32, #tpu.memory_space<vmem>>, vector<8x128xf32>
    tpu.vector_store %arg10[%c0_21, %c0_22], %30 {strides = array<i32>} : memref<8x128xf32, #tpu.memory_space<vmem>>, vector<8x128xf32>,
    return
  }
  func.func @transform_0(%arg0: i32) -> (i32, i32) {
    %c0_i32 = arith.constant 0 : i32
    %c0_i32_0 = arith.constant 0 : i32
    return %arg0, %c0_i32 : i32, i32
  }
  func.func @transform_1(%arg0: i32) -> (i32, i32) {
    %c0_i32 = arith.constant 0 : i32
    %c0_i32_0 = arith.constant 0 : i32
    return %arg0, %c0_i32 : i32, i32
  }
  func.func @transform_2(%arg0: i32) -> (i32, i32) {
    %c0_i32 = arith.constant 0 : i32
    %c0_i32_0 = arith.constant 0 : i32
    return %arg0, %c0_i32 : i32, i32
  }
  func.func @transform_3(%arg0: i32) -> (i32, i32) {
    %c0_i32 = arith.constant 0 : i32
    %c0_i32_0 = arith.constant 0 : i32
    %c0_i32_1 = arith.constant 0 : i32
    return %c0_i32, %c0_i32_0 : i32, i32
  }
  func.func @transform_4(%arg0: i32) -> (i32, i32) {
    %c0_i32 = arith.constant 0 : i32
    %c0_i32_0 = arith.constant 0 : i32
    %c0_i32_1 = arith.constant 0 : i32
    return %c0_i32, %c0_i32_0 : i32, i32
  }
  func.func @transform_5(%arg0: i32) -> (i32, i32) {
    %c0_i32 = arith.constant 0 : i32
    %c0_i32_0 = arith.constant 0 : i32
    %c0_i32_1 = arith.constant 0 : i32
    return %c0_i32, %c0_i32_0 : i32, i32
  }
  func.func @transform_6(%arg0: i32) -> (i32, i32) {
    %c0_i32 = arith.constant 0 : i32
    %c0_i32_0 = arith.constant 0 : i32
    %c0_i32_1 = arith.constant 0 : i32
    return %c0_i32, %c0_i32_0 : i32, i32
  }
  func.func @transform_7(%arg0: i32) -> (i32, i32) {
    %c0_i32 = arith.constant 0 : i32
    %c0_i32_0 = arith.constant 0 : i32
    %c0_i32_1 = arith.constant 0 : i32
    return %c0_i32, %c0_i32_0 : i32, i32
  }
  func.func @transform_8(%arg0: i32) -> (i32, i32) {
    %c0_i32 = arith.constant 0 : i32
    %c0_i32_0 = arith.constant 0 : i32
    %c0_i32_1 = arith.constant 0 : i32
    return %c0_i32, %c0_i32_0 : i32, i32
  }
  func.func @transform_9(%arg0: i32) -> (i32, i32) {
    %c0_i32 = arith.constant 0 : i32
    %c0_i32_0 = arith.constant 0 : i32
    return %arg0, %c0_i32 : i32, i32
  }
}

</mosaic_0001>

<bundles_post_ra>
// kernel: tpu_custom_call.1
= control target key start
LH: loop header
LB: loop body
LE: loop exit
PB: predicated region body
PF: predicated region fallthrough
CT: control target
= control target key end

     0   :  { %s2148_s0 = inlined_call_operand.hbm [shape: bf16[128,128], index: 0, kind: input, shape index: {}]   ;;  %s2149_s1 = inlined_call_operand.hbm [shape: bf16[128,128], index: 1, kind: input, shape index: {}]   ;;  %s2150_s2 = inlined_call_operand.vmem [shape: f32[16,8], index: 2, kind: input, shape index: {}]   ;;  %s2151_s3 = inlined_call_operand.hbm [shape: bf16[128,128], index: 3, kind: input, shape index: {}]   ;;  %s2152_s4 = inlined_call_operand.vmem [shape: f32[1,128], index: 4, kind: input, shape index: {}]   ;;  %s2153_s5 = inlined_call_operand.hbm [shape: bf16[128,128], index: 5, kind: input, shape index: {}]   ;;  %s2154_s6 = inlined_call_operand.vmem [shape: f32[1,128], index: 6, kind: input, shape index: {}]   ;;  %s2155_s7 = inlined_call_operand.hbm [shape: bf16[256,128], index: 7, kind: input, shape index: {}]   ;;  %s2156_s8 = inlined_call_operand.vmem [shape: f32[1,128], index: 8, kind: input, shape index: {}]   ;;  %s2157_s9 = inlined_call_operand.hbm [shape: f32[16,128], index: 9, kind: output, shape index: {}]  }
   0x1   :  { %2165 = sst [smem:[#allocation20_spill]] %s2148_s0 }
   0x2   :  { %2166 = sst [smem:[#allocation21_spill]] %s2151_s3 }
   0x3   :  { %2167 = sst [smem:[#allocation22_spill]] %s2153_s5 }
   0x4   :  { %2168 = sst [smem:[#allocation23_spill]] %s2155_s7 }
   0x5   :  { %14 = vsyncpa [#allocation3], 0 }
   0x6   :  { %16 = vsyncpa [#allocation3 + $0x1], 0 }
   0x7   :  { %17 = vsyncpa [#allocation6], 0 }
   0x8   :  { %19 = vsyncpa [#allocation6 + $0x1], 0 }
   0x9   :  { %20 = vsyncpa [#allocation9], 0 }
   0xa   :  { %21 = vsyncpa [#allocation4], 0 }
   0xb   :  { %23 = vsyncpa [#allocation4 + $0x1], 0  ;;  %s1888_s30 = smov 0   ;;  %s1890_s10 = smov 0  }
   0xc   :  { %s1892_s11 = smov 0   ;;  %s1894_s12 = smov 0  }
   0xd LB: > { %2169 = sst [smem:[#allocation17_spill]] %s1827_s11  ;;  %s1909_s13 = sadd.s32 4294967295, %s1831_s12   ;;  %s1831_s12 = sphi %s1894_s12, %s2185_s12   ;;  %s1827_s11 = sphi %s1892_s11, %s2187_s11   ;;  %s1823_s10 = sphi %s1890_s10, %s2189_s10   ;;  %s1819_s30 = sphi %s1888_s30, %s2188_s30  }
   0xe   : > { %s1255_s14 = sadd.s32 4294967294, %s1831_s12   ;;  %p49_p0 = scmp.ne.s32.totalorder %s1823_s10, %s1819_s30 }
   0xf   : > { %p50_p1 = scmp.eq.s32.totalorder %s1909_s13, 0  ;;  %p251_p2 = scmp.eq.s32.totalorder %s1909_s13, 1 }
  0x10   : > { %p257_p3 = scmp.eq.s32.totalorder %s1255_s14, 1  ;;  %p1256_p5 = scmp.ge.s32.totalorder %s1831_s12, 1 }
  0x11   : > { %p1918_p4 = por %p50_p1, %p49_p0  ;;  %p264_p7 = scmp.lt.s32.totalorder %s1831_s12, 3 }
  0x12   : > { %p1923_p6 = por %p257_p3, %p49_p0  ;;  %s2172_s3 = sld [smem:[#allocation21_spill]] }
  0x13   : > { %p1931_p8 = pnand %p1256_p5, %p264_p7  ;;  %s1833_s21 = smov [#allocation7]  }
  0x14   : > { %s277_s22 = sshll.u32 %s1833_s21, 4  ;;  %s2175_s5 = sld [smem:[#allocation22_spill]]  ;;  %s278_s22 = int_to_ptr.vmem [resolvable:$true] %s277_s22 }
  0x15   : > { %p1499_p9 = pneg %p1931_p8  ;;  %s2158_s27 = smov 64  }
  0x16   : > { %s2160_s28 = smov 4   ;;  %s1836_s29 = smov [#allocation8]  }
  0x17   : > { %p1939_p10 = pnand %p1499_p9, %p50_p1  ;;  %s294_s14 = sshll.u32 %s1836_s29, 4  ;;  %s295_s14 = int_to_ptr.vmem [resolvable:$true] %s294_s14 }
  0x18   : > { %s275_s19 = sshll.u32 %s2172_s3, 4  ;;  %s2176_s7 = sld [smem:[#allocation23_spill]]  ;;  %s276_s19 = int_to_ptr.hbm [resolvable:$true] %s275_s19 }
  0x19   : > { %1502 = dma.hbm_to_vmem [thread:$0]  (!%p1939_p10), %s276_s19, 1024, %s278_s22, [#allocation6], %s2158_s27, %s2158_s27, %s2160_s28  }
  0x1a   : > { %s292_s26 = sshll.u32 %s2175_s5, 4  ;;  %s1837_s19 = smov [#allocation10]   ;;  %s293_s26 = int_to_ptr.hbm [resolvable:$true] %s292_s26 }
  0x1b   : > { %1505 = dma.hbm_to_vmem [thread:$0]  (!%p1939_p10), %s293_s26, 1024, %s295_s14, [#allocation9], %s2158_s27, %s2158_s27, %s2160_s28  }
  0x1c   : > { %s311_s22 = sshll.u32 %s1837_s19, 4  ;;  %s1961_s24 = sadd.s32 1, %s1831_s12   ;;  %s312_s22 = int_to_ptr.vmem [resolvable:$true] %s311_s22 }
  0x1d   : > { %2177 = sst [smem:[#allocation18_spill]] %s1961_s24  ;;  %s33_s25 = ssub.s32 %s1831_s12, %s1961_s24 }
  0x1e   : > { %s309_s21 = sshll.u32 %s2176_s7, 4  ;;  %s36_s29 = sadd.s32 1, %s1827_s11  ;;  %s310_s21 = int_to_ptr.hbm [resolvable:$true] %s309_s21 }
  0x1f   : > { %1508 = dma.hbm_to_vmem [thread:$0]  (!%p1939_p10), %s310_s21, 2048, %s312_s22, [#allocation9], %s2158_s27, %s2158_s27, %s2160_s28  }
  0x20   : > { %p34_p12 = scmp.eq.s32.totalorder %s33_s25, 0  ;;  %p43_p13 = scmp.ne.s32.totalorder %s1827_s11, %s1823_s10 }
  0x21   : > { %p44_p0 = scmp.eq.s32.totalorder %s1831_s12, 0  ;;  %p1523_p3 = scmp.lt.s32.totalorder %s1831_s12, 2 }
  0x22   : > { %s1976_s26 = scalar_select %p34_p12, %s1827_s11, %s36_s29  }
  0x23   : > { %p45_p5 = por %p44_p0, %p43_p13  ;;  %p1980_p7 = por %p251_p2, %p43_p13 }
  0x24   : > { %2178 = sst [smem:[#allocation19_spill]] %s1976_s26  ;;  %s328_s23 = sand.u32 1, %s1827_s11  }
  0x25   : > { %s1439_s17 = sshll.u32 %s1831_s12, 5  ;;  %s1261_s18 = sshll.u32 %s328_s23, 5 }
  0x26   : > { %s2180_s0 = sld [smem:[#allocation20_spill]]  ;;  %s332_s27 = scalar_lea.vmem [#allocation2], %s1261_s18 }
  0x27   : > { %s340_s28 = sshll.u32 %s332_s27, 4  ;;  %p1991_p9 = pnand %p1523_p3, %p45_p5  ;;  %s341_s28 = int_to_ptr.vmem [resolvable:$true] %s340_s28 }
  0x28   : > { %s359_s7 = scalar_lea.hbm %s2149_s1, %s1439_s17  ;;  %s354_s26 = scalar_lea.vmem [#allocation5], %s1261_s18 }
  0x29   : > { %s1998_s11 = sshll.u32 %s354_s26, 4  ;;  %s360_s19 = sshll.u32 %s359_s7, 4  ;;  %s361_s19 = int_to_ptr.hbm [resolvable:$true] %s360_s19  ;;  %s363_s11 = int_to_ptr.vmem [resolvable:$true] %s1998_s11 }
  0x2a   : > { %s329_s21 = scalar_lea.sflag [#allocation3], %s328_s23  ;;  %p1697_p10 = pneg %p1991_p9 }
  0x2c   : > { %s337_s22 = scalar_lea.hbm %s2180_s0, %s1439_s17  ;;  %s1700_s5 = scalar_lea.hbm %s2180_s0, 64 }
  0x2d   : > { %s338_s25 = sshll.u32 %s337_s22, 4  ;;  %s339_s25 = int_to_ptr.hbm [resolvable:$true] %s338_s25 }
  0x2e   : > { %s1693_s22 = sshra.s32 %s339_s25, 4  ;;  %s1694_s22 = int_to_ptr.hbm [resolvable:$true] %s1693_s22 }
  0x2f   : > { %s1695_s27 = scalar_lea.hbm %s1694_s22, 32  ;;  %p1701_p0 = scmp.lt.s32.totalorder %s1694_s22, %s2180_s0 }
  0x30   : > { %p1696_p2 = scmp.ne.s32.totalorder %s1694_s22, %s1695_s27  ;;  %p1702_p3 = scmp.lt.s32.totalorder %s1700_s5, %s1695_s27 }
  0x32   : > { %p1698_p12 = pnand %p1697_p10, %p1696_p2  ;;  %p1703_p5 = por %p1702_p3, %p1701_p0 }
  0x34   : > { %p1699_p13 = pneg %p1698_p12 }
  0x36   : > { %p1704_p11 = pnand %p1703_p5, %p1699_p13 }
  0x38   : > { %1707 = shalt.err (!%p1704_p11)
}
  0x39   : > { %s2182_s7 = smov 4   ;;  %s2183_s26 = smov 64  }
  0x3a   : > { %1512 = dma.hbm_to_vmem [thread:$0]  (!%p1991_p9), %s339_s25, 512, %s341_s28, %s329_s21, %s2183_s26, %s2183_s26, %s2182_s7  }
  0x3b   : > { %s350_s24 = sand.u32 1, %s1831_s12   ;;  %s1723_s3 = sshra.s32 %s361_s19, 4  ;;  %s1724_s3 = int_to_ptr.hbm [resolvable:$true] %s1723_s3 }
  0x3c   : > { %s351_s23 = scalar_lea.sflag [#allocation6], %s350_s24  ;;  %s1725_s22 = scalar_lea.hbm %s1724_s3, 32 }
  0x3d   : > { %p1726_p2 = scmp.ne.s32.totalorder %s1724_s3, %s1725_s22  ;;  %s1730_s17 = scalar_lea.hbm %s2149_s1, 64 }
  0x3e   : > { %p1731_p13 = scmp.lt.s32.totalorder %s1724_s3, %s2149_s1  ;;  %p1732_p0 = scmp.lt.s32.totalorder %s1730_s17, %s1725_s22 }
  0x3f   : > { %p1728_p11 = pnand %p1726_p2, %p1697_p10 }
  0x40   : > { %p1733_p3 = por %p1732_p0, %p1731_p13 }
  0x41   : > { %p1729_p12 = pneg %p1728_p11 }
  0x43   : > { %p1734_p5 = pnand %p1733_p3, %p1729_p12 }
  0x45   : > { %1737 = shalt.err (!%p1734_p5)
}
  0x46   : > { %1515 = dma.hbm_to_vmem [thread:$0]  (!%p1991_p9), %s361_s19, 512, %s363_s11, %s351_s23, %s2183_s26, %s2183_s26, %s2182_s7  }
  0x47   : > { %381 = sbr.rel (%p1931_p8) target bundleno = 465 (0x1d1), region = 56  ;;  %s2035_s28 = sand.u32 (!%p1931_p8), 1, %s1823_s10  }
  0x48   : > { %s1268_s0 = sshll.u32 (!%p1931_p8), %s2035_s28, 5  ;;  %s384_s25 = scalar_lea.sflag (!%p1931_p8), [#allocation3], %s2035_s28 }
  0x49   : > { %s2039_s21 = scalar_lea.vmem (!%p1931_p8), [#allocation2], %s1268_s0 }
  0x4c   : > { %1798 = dma.done.wait (%p1918_p4), %s384_s25, 512  }
  0x4d   : > { %1800 = vsyncadd (%p1918_p4), %s384_s25, 4294966784  ;;  %s393_s11 = sand.u32 1, %s1909_s13   ;;  %s2046_s29 = scalar_lea.vmem [#allocation5], %s1268_s0 }
  0x4e   : > { %s394_s20 = scalar_lea.sflag [#allocation6], %s393_s11 }
  0x4f   : > { %1802 = dma.done.wait (%p1918_p4), %s394_s20, 512  }
  0x50   : > { %1804 = vsyncadd (%p1918_p4), %s394_s20, 4294966784 }
  0x51   : > { %1806 = dma.done.wait (%p50_p1), [#allocation6], 1024  }
  0x52   : > { %1808 = vsyncadd (%p50_p1), [#allocation6], 4294966272 }
  0x53   : > { %1810 = dma.done.wait (%p50_p1), [#allocation9], 3072  }
  0x54   : > { %1812 = vsyncadd (%p50_p1), [#allocation9], 4294964224  ;;  %v1452_v0 = vld [vmem:[#allocation7 + $0x38] sm:$0xff]  ;;  %v739_v2 = vlaneseq  ;;  %v1451_v3 = vld [vmem:[#allocation7 + $0x30] sm:$0xff]  ;;  %p459_p4 = scmp.lt.s32.totalorder %s1909_s13, 1  ;;  %vm914_vm0 = vcmask 1041409  }
  0x55   : > { %v1464_v1 = vld [vmem:[#allocation8 + $0x38] sm:$0xff]  ;;  %563 = vmatpush.bf16.msra.mxu0 %v1452_v0  ;;  %v1463_v4 = vld [vmem:[#allocation8 + $0x30] sm:$0xff]  ;;  %v1450_v6 = vld [vmem:[#allocation7 + $0x28] sm:$0xff]  ;;  %vm916_vm1 = vcmask 1042434   ;;  %vm918_vm2 = vcmask 1043459   ;;  %vm920_vm3 = vcmask 1044484  }
  0x56   : > { %700 = vmatpush.bf16.msra.mxu1 %v1464_v1  ;;  %v740_v5 = vshrl.u32 %v739_v2, 7  ;;  %v1462_v7 = vld [vmem:[#allocation8 + $0x28] sm:$0xff]  ;;  %s460_s15 = scalar_select %p459_p4, %s1909_s13, 1  ;;  %v1449_v8 = vld [vmem:[#allocation7 + $0x20] sm:$0xff]  ;;  %v1448_v10 = vld [vmem:[#allocation7 + $0x18] sm:$0xff]  ;;  %vm922_vm4 = vcmask 1045509  }
  0x57   : > { %v1461_v9 = vld [vmem:[#allocation8 + $0x20] sm:$0xff]  ;;  %v1460_v11 = vld [vmem:[#allocation8 + $0x18] sm:$0xff]  ;;  %v1447_v13 = vld [vmem:[#allocation7 + $0x10] sm:$0xff]  ;;  %vm924_vm5 = vcmask 1046534   ;;  %vm926_vm6 = vcmask 1047559   ;;  %s1273_s5 = sshll.u32 %s2035_s28, 3 }
  0x58   : > { %1565 = vset.pattern.permute.xlu0 %v740_v5  ;;  %1566 = vset.pattern.permute.xlu1 %v740_v5  ;;  %s1274_s19 = sshll.u32 %s460_s15, 3  ;;  %v1459_v14 = vld [vmem:[#allocation8 + $0x10] sm:$0xff]  ;;  %v1446_v16 = vld [vmem:[#allocation7 + $0x8] sm:$0xff]  ;;  %v1445_v19 = vld [vmem:[#allocation7] sm:$0xff]  ;;  %s1436_s17 = sshll.u32 %s1909_s13, 3 }
  0x59   : > { %564 = vmatpush.bf16.msra.mxu0 %v1451_v3  ;;  %1567 = vset.pattern.permute.xlu2 %v740_v5  ;;  %s462_s24 = scalar_lea.vmem %s2150_s2, %s1274_s19  ;;  %v1458_v17 = vld [vmem:[#allocation8 + $0x8] sm:$0xff]  ;;  %v1457_v20 = vld [vmem:[#allocation8] sm:$0xff]  ;;  %v1443_v31 = vld [vmem:[%s2039_s21 + $0x10] sm:$0xff]  ;;  %s1117_s11 = scalar_lea.hbm %s2157_s9, %s1436_s17 }
  0x5a   : > { %701 = vmatpush.bf16.msra.mxu1 %v1463_v4  ;;  %v737_v12 = vld [vmem:[%s462_s24] sm:$0xff]  ;;  %v1442_v25 = vld [vmem:[%s2039_s21 + $0x8] sm:$0xff]  ;;  %v1455_v32 = vld [vmem:[%s2046_s29 + $0x10] sm:$0xff]  ;;  %s456_s20 = scalar_lea.vmem [#allocation11], %s1273_s5  ;;  %s1121_s15 = sshll.u32 %s1117_s11, 4  ;;  %s1122_s15 = int_to_ptr.hbm [resolvable:$true] %s1121_s15 }
  0x5b   : > { %v738_v15 = vperm.slane %v737_v12, 0  ;;  %v745_v18 = vperm.slane %v737_v12, 1  ;;  %v1441_v21 = vld [vmem:[%s2039_s21] sm:$0xff]  ;;  %v752_v23 = vperm.slane %v737_v12, 2  ;;  %v759_v24 = vperm.slane %v737_v12, 3  ;;  %v1454_v26 = vld [vmem:[%s2046_s29 + $0x8] sm:$0xff] }
  0x5c   : > { %v1453_v22 = vld [vmem:[%s2046_s29] sm:$0xff]  ;;  %v780_v27 = vperm.slane %v737_v12, 6  ;;  %v787_v28 = vperm.slane %v737_v12, 7  ;;  %v766_v29 = vperm.slane %v737_v12, 4  ;;  %v773_v30 = vperm.slane %v737_v12, 5  ;;  %v1444_v33 = vld [vmem:[%s2039_s21 + $0x18] sm:$0xff] }
  0x5d   : > { %565 = vmatpush.bf16.msra.mxu0 %v1450_v6  ;;  %v1456_v34 = vld [vmem:[%s2046_s29 + $0x18] sm:$0xff]  ;;  %v2076_v41 = vld [vmem:[%s2152_s4] ss:$0 sm:$0xff]  ;;  %v1471_v47 = vld [vmem:[#allocation10 + $0x30] sm:$0xff]  ;;  %s1119_s29 = sshll.u32 %s456_s20, 4  ;;  %s1107_s13 = scalar_lea.sflag [#allocation4], %s2035_s28  ;;  %s1120_s29 = int_to_ptr.vmem [resolvable:$true] %s1119_s29 }
  0x5e   : > { %702 = vmatpush.bf16.msra.mxu1 %v1462_v7  ;;  %v2081_v42 = vld [vmem:[%s2154_s6] ss:$0 sm:$0xff]  ;;  %v1472_v43 = vld [vmem:[#allocation10 + $0x38] sm:$0xff]  ;;  %v1479_v48 = vld [vmem:[#allocation10 + $0x70] sm:$0xff]  ;;  %s1767_s19 = sshra.s32 %s1122_s15, 4  ;;  %s1773_s23 = scalar_lea.hbm %s2157_s9, 16  ;;  %s1768_s19 = int_to_ptr.hbm [resolvable:$true] %s1767_s19 }
  0x5f   : > { %v1480_v44 = vld [vmem:[#allocation10 + $0x78] sm:$0xff]  ;;  %1079 = vmatpush.bf16.msra.mxu2 %v1472_v43  ;;  %v1470_v53 = vld [vmem:[#allocation10 + $0x28] sm:$0xff]  ;;  %v1469_v57 = vld [vmem:[#allocation10 + $0x20] sm:$0xff]  ;;  %s1769_s7 = scalar_lea.hbm %s1768_s19, 8  ;;  %p1774_p10 = scmp.lt.s32.totalorder %s1768_s19, %s2157_s9 }
  0x60   : > { %743 = vperm.xlu0 %1565, %v738_v15   ;;  %757 = vperm.xlu1 %1566, %v752_v23   ;;  %v1478_v54 = vld [vmem:[#allocation10 + $0x68] sm:$0xff]  ;;  %v1477_v58 = vld [vmem:[#allocation10 + $0x60] sm:$0xff]  ;;  %v1468_v5 = vld [vmem:[#allocation10 + $0x18] sm:$0xff]  ;;  %p1770_p1 = scmp.ne.s32.totalorder %s1768_s19, %s1769_s7  ;;  %p1775_p2 = scmp.lt.s32.totalorder %s1773_s23, %s1769_s7 }
  0x61   : > { %566 = vmatpush.bf16.msra.mxu0 %v1449_v8  ;;  %771 = vperm.xlu2 %1567, %v766_v29   ;;  %v1476_v6 = vld [vmem:[#allocation10 + $0x58] sm:$0xff]  ;;  %v1475_v15 = vld [vmem:[#allocation10 + $0x50] sm:$0xff]  ;;  %v1474_v23 = vld [vmem:[#allocation10 + $0x48] sm:$0xff] }
  0x62   : > { %703 = vmatpush.bf16.msra.mxu1 %v1461_v9  ;;  %1092 = vmatpush.bf16.msra.mxu3 %v1480_v44  ;;  %p1771_p8 = pnand %p1770_p1, %p1980_p7  ;;  %p1776_p11 = por %p1775_p2, %p1774_p10 }
  0x63   : > { %1080 = vmatpush.bf16.msra.mxu2 %v1471_v47 }
  0x64   : > { %p1772_p9 = pneg %p1771_p8 }
  0x65   : > { %567 = vmatpush.bf16.msra.mxu0 %v1448_v10 }
  0x66   : > { %704 = vmatpush.bf16.msra.mxu1 %v1460_v11  ;;  %1093 = vmatpush.bf16.msra.mxu3 %v1479_v48  ;;  %p1777_p12 = pnand %p1776_p11, %p1772_p9 }
  0x67   : > { %1081 = vmatpush.bf16.msra.mxu2 %v1470_v53 }
  0x68   : > { %750 = vperm.xlu0 %1565, %v745_v18   ;;  %764 = vperm.xlu1 %1566, %v759_v24  }
  0x69   : > { %568 = vmatpush.bf16.msra.mxu0 %v1447_v13  ;;  %778 = vperm.xlu2 %1567, %v773_v30  }
  0x6a   : > { %705 = vmatpush.bf16.msra.mxu1 %v1459_v14  ;;  %1094 = vmatpush.bf16.msra.mxu3 %v1478_v54  ;;  %v1467_v14 = vld [vmem:[#allocation10 + $0x10] sm:$0xff] }
  0x6b   : > { %1082 = vmatpush.bf16.msra.mxu2 %v1469_v57 }
  0x6d   : > { %569 = vmatpush.bf16.msra.mxu0 %v1446_v16 }
  0x6e   : > { %706 = vmatpush.bf16.msra.mxu1 %v1458_v17  ;;  %1095 = vmatpush.bf16.msra.mxu3 %v1477_v58 }
  0x6f   : > { %1083 = vmatpush.bf16.msra.mxu2 %v1468_v5 }
  0x70   : > { %785 = vperm.xlu0 %1565, %v780_v27   ;;  %792 = vperm.xlu1 %1566, %v787_v28  }
  0x71   : > { %570 = vmatpush.bf16.msra.mxu0 %v1445_v19 }
  0x72   : > { %707 = vmatpush.bf16.msra.mxu1 %v1457_v20  ;;  %1096 = vmatpush.bf16.msra.mxu3 %v1476_v6 }
  0x73   : > { %1084 = vmatpush.bf16.msra.mxu2 %v1467_v14 }
  0x74   : > { %571 = vmatmul.bf16.vlgmr.msra.gmra.mxu0 %v1441_v21 }
  0x75   : > { %708 = vmatmul.bf16.vlgmr.msra.gmra.mxu1 %v1453_v22  ;;  %v1466_v22 = vld [vmem:[#allocation10 + $0x8] sm:$0xff] }
  0x76   : > { %1097 = vmatpush.bf16.msra.mxu3 %v1475_v15 }
  0x77   : > { %1085 = vmatpush.bf16.msra.mxu2 %v1466_v22 }
  0x7a   : > { %1098 = vmatpush.bf16.msra.mxu3 %v1474_v23 }
  0x84   : > { %576 = vmatmul.bf16.gmra.mxu0 %v1442_v25 }
  0x85   : > { %713 = vmatmul.bf16.gmra.mxu1 %v1454_v26 }
  0x94   : > { %581 = vmatmul.bf16.gmra.mxu0 %v1443_v31 }
  0x95   : > { %718 = vmatmul.bf16.gmra.mxu1 %v1455_v32 }
  0xa4   : > { %586 = vmatmul.bf16.gmra.mxu0 %v1444_v33  ;;  %v1465_v33 = vld [vmem:[#allocation10] sm:$0xff] }
  0xa5   : > { %723 = vmatmul.bf16.gmra.mxu1 %v1456_v34  ;;  %v1473_v34 = vld [vmem:[#allocation10 + $0x40] sm:$0xff]  ;;  %1086 = vmatpush.bf16.msra.mxu2 %v1465_v33 }
  0xa6   : > { %1099 = vmatpush.bf16.msra.mxu3 %v1473_v34 }
  0xbb   : > { %v772_v11 = vpop.permute.xlu2 %771 }
  0xc3   : > { %v779_v43 = vpop.permute.xlu2 %778 }
  0xd2   : > { %v744_v52 = vpop.permute.xlu0 %743  ;;  %v758_v4 = vpop.permute.xlu1 %757 }
  0xda   : > { %v751_v9 = vpop.permute.xlu0 %750  ;;  %v765_v32 = vpop.permute.xlu1 %764 }
  0xf1   : > { %v572_v35 = vpop.f32.mrf.mxu0 }
  0xf2   : > { %v709_v36 = vpop.f32.mrf.mxu1  ;;  %v573_v45 = vadd.f32 %v2076_v41, %v572_v35 }
  0xf3   : > { %v710_v46 = vadd.f32 %v2081_v42, %v709_v36 }
  0xf4   : > { %1571 = vtanh.f32 %v573_v45 }
  0xf5   : > { %1573 = vtanh.f32 %v710_v46 }
  0xf9   : > { %v574_v37 = vpop.f32.mrf.mxu0 }
  0xfa   : > { %v711_v38 = vpop.f32.mrf.mxu1  ;;  %v575_v51 = vadd.f32 %v2076_v41, %v574_v37  ;;  %v1572_v56 = vpop.eup %1571 }
  0xfb   : > { %v712_v55 = vadd.f32 %v2081_v42, %v711_v38  ;;  %v1574_v59 = vpop.eup %1573  ;;  %v794_v0 = vmul.f32 %v1572_v56, %v744_v52 }
  0xfc   : > { %1575 = vtanh.f32 %v575_v51  ;;  %v850_v2 = vmul.f32 %v1574_v59, %v744_v52 }
  0xfd   : > { %1577 = vtanh.f32 %v712_v55  ;;  %v802_v12 = vrot.slane %v794_v0, 4 }
  0xfe   : > { %v858_v13 = vrot.slane %v850_v2, 4 }
  0xff   : > { %v803_v25 = vadd.f32 %v802_v12, %v794_v0 }
 0x100   : > { %v859_v27 = vadd.f32 %v858_v13, %v850_v2 }
 0x101   : > { %v577_v39 = vpop.f32.mrf.mxu0  ;;  %v804_v36 = vrot.slane %v803_v25, 2 }
 0x102   : > { %v714_v40 = vpop.f32.mrf.mxu1  ;;  %v578_v60 = vadd.f32 %v2076_v41, %v577_v39  ;;  %v1576_v8 = vpop.eup %1575  ;;  %v860_v39 = vrot.slane %v859_v27, 2 }
 0x103   : > { %v715_v63 = vadd.f32 %v2081_v42, %v714_v40  ;;  %v1578_v16 = vpop.eup %1577  ;;  %v795_v17 = vmul.f32 %v1576_v8, %v751_v9  ;;  %v805_v55 = vadd.f32 %v804_v36, %v803_v25 }
 0x104   : > { %1579 = vtanh.f32 %v578_v60  ;;  %v851_v28 = vmul.f32 %v1578_v16, %v751_v9  ;;  %v861_v59 = vadd.f32 %v860_v39, %v859_v27 }
 0x105   : > { %1581 = vtanh.f32 %v715_v63  ;;  %v808_v30 = vrot.slane %v795_v17, 4  ;;  %v806_v6 = vrot.slane %v805_v55, 1 }
 0x106   : > { %v864_v40 = vrot.slane %v851_v28, 4  ;;  %v862_v9 = vrot.slane %v861_v59, 1 }
 0x107   : > { %v809_v44 = vadd.f32 %v808_v30, %v795_v17 }
 0x108   : > { %v865_v60 = vadd.f32 %v864_v40, %v851_v28 }
 0x109   : > { %v579_v49 = vpop.f32.mrf.mxu0 }
 0x10a   : > { %v716_v50 = vpop.f32.mrf.mxu1  ;;  %v580_v1 = vadd.f32 %v2076_v41, %v579_v49  ;;  %v1580_v24 = vpop.eup %1579 }
 0x10b   : > { %v717_v3 = vadd.f32 %v2081_v42, %v716_v50  ;;  %v1582_v26 = vpop.eup %1581  ;;  %v796_v37 = vmul.f32 %v1580_v24, %v758_v4 }
 0x10c   : > { %1583 = vtanh.f32 %v580_v1  ;;  %v852_v45 = vmul.f32 %v1582_v26, %v758_v4 }
 0x10d   : > { %1585 = vtanh.f32 %v717_v3  ;;  %v814_v56 = vrot.slane %v796_v37, 4 }
 0x10e   : > { %v870_v63 = vrot.slane %v852_v45, 4 }
 0x10f   : > { %v815_v3 = vadd.f32 %v814_v56, %v796_v37 }
 0x111   : > { %v582_v61 = vpop.f32.mrf.mxu0  ;;  %v816_v22 = vrot.slane %v815_v3, 2 }
 0x112   : > { %v719_v62 = vpop.f32.mrf.mxu1  ;;  %v583_v7 = vadd.f32 %v2076_v41, %v582_v61  ;;  %v1584_v29 = vpop.eup %1583 }
 0x113   : > { %v720_v10 = vadd.f32 %v2081_v42, %v719_v62  ;;  %v1586_v31 = vpop.eup %1585  ;;  %v797_v46 = vmul.f32 %v1584_v29, %v765_v32  ;;  %v810_v62 = vrot.slane %v809_v44, 2 }
 0x114   : > { %1587 = vtanh.f32 %v583_v7  ;;  %v853_v47 = vmul.f32 %v1586_v31, %v765_v32  ;;  %v866_v7 = vrot.slane %v865_v60, 2 }
 0x115   : > { %1589 = vtanh.f32 %v720_v10  ;;  %v820_v0 = vrot.slane %v797_v46, 4  ;;  %v811_v10 = vadd.f32 %v810_v62, %v809_v44  ;;  %v863_v44 = vadd.f32 %v862_v9, %v861_v59 }
 0x116   : > { %v876_v1 = vrot.slane %v853_v47, 4  ;;  %v867_v26 = vadd.f32 %v866_v7, %v865_v60 }
 0x117   : > { %v821_v12 = vadd.f32 %v820_v0, %v797_v46  ;;  %v812_v32 = vrot.slane %v811_v10, 1 }
 0x118   : > { %v877_v16 = vadd.f32 %v876_v1, %v853_v47  ;;  %v868_v39 = vrot.slane %v867_v26, 1 }
 0x119   : > { %v584_v18 = vpop.f32.mrf.mxu0  ;;  %v822_v30 = vrot.slane %v821_v12, 2 }
 0x11a   : > { %v721_v19 = vpop.f32.mrf.mxu1  ;;  %v585_v20 = vadd.f32 %v2076_v41, %v584_v18  ;;  %v1588_v35 = vpop.eup %1587  ;;  %v878_v33 = vrot.slane %v877_v16, 2  ;;  %v869_v60 = vadd.f32 %v868_v39, %v867_v26 }
 0x11b   : > { %v722_v21 = vadd.f32 %v2081_v42, %v721_v19  ;;  %v1590_v38 = vpop.eup %1589  ;;  %v798_v51 = vmul.f32 %v1588_v35, %v772_v11  ;;  %v786_v18 = vpop.permute.xlu0 %785  ;;  %v817_v35 = vadd.f32 %v816_v22, %v815_v3  ;;  %v823_v46 = vadd.f32 %v822_v30, %v821_v12 }
 0x11c   : > { %1591 = vtanh.f32 %v585_v20  ;;  %v854_v57 = vmul.f32 %v1590_v38, %v772_v11  ;;  %v871_v11 = vadd.f32 %v870_v63, %v852_v45  ;;  %v807_v38 = vadd.f32 %v806_v6, %v805_v55 }
 0x11d   : > { %1593 = vtanh.f32 %v722_v21  ;;  %v826_v2 = vrot.slane %v798_v51, 4  ;;  %v818_v56 = vrot.slane %v817_v35, 1  ;;  %v824_v0 = vrot.slane %v823_v46, 1 }
 0x11e   : > { %v882_v4 = vrot.slane %v854_v57, 4  ;;  %v872_v29 = vrot.slane %v871_v11, 2 }
 0x11f   : > { %v827_v17 = vadd.f32 %v826_v2, %v798_v51  ;;  %v819_v7 = vadd.f32 %v818_v56, %v817_v35 }
 0x120   : > { %v883_v23 = vadd.f32 %v882_v4, %v854_v57  ;;  %v873_v45 = vadd.f32 %v872_v29, %v871_v11 }
 0x121   : > { %v587_v48 = vpop.f32.mrf.mxu0  ;;  %v828_v34 = vrot.slane %v827_v17, 2 }
 0x122   : > { %v724_v49 = vpop.f32.mrf.mxu1  ;;  %v1592_v50 = vpop.eup %1591  ;;  %v588_v52 = vadd.f32 %v2076_v41, %v587_v48  ;;  %v874_v63 = vrot.slane %v873_v45, 1 }
 0x123   : > { %v725_v53 = vadd.f32 %v2081_v42, %v724_v49  ;;  %v1594_v54 = vpop.eup %1593  ;;  %v799_v58 = vmul.f32 %v1592_v50, %v779_v43  ;;  %v813_v49 = vadd.f32 %v812_v32, %v811_v10  ;;  %v879_v50 = vadd.f32 %v878_v33, %v877_v16 }
 0x124   : > { %1595 = vtanh.f32 %v588_v52  ;;  %v855_v61 = vmul.f32 %v1594_v54, %v779_v43  ;;  %v829_v51 = vadd.f32 %v828_v34, %v827_v17 }
 0x125   : > { %1597 = vtanh.f32 %v725_v53  ;;  %v832_v5 = vrot.slane %v799_v58, 4  ;;  %v793_v53 = vpop.permute.xlu1 %792  ;;  %v915_v3 = vsel %vm914_vm0, %v813_v49, %v807_v38  ;;  %v880_v4 = vrot.slane %v879_v50, 1 }
 0x126   : > { %v888_v8 = vrot.slane %v855_v61, 4  ;;  %v917_v22 = vsel %vm916_vm1, %v819_v7, %v915_v3 }
 0x127   : > { %v833_v25 = vadd.f32 %v832_v5, %v799_v58  ;;  %v830_v5 = vrot.slane %v829_v51, 1 }
 0x128   : > { %v889_v28 = vadd.f32 %v888_v8, %v855_v61 }
 0x129   : > { %v589_v13 = vpop.f32.mrf.mxu0  ;;  %v834_v37 = vrot.slane %v833_v25, 2 }
 0x12a   : > { %v726_v14 = vpop.f32.mrf.mxu1  ;;  %v1596_v15 = vpop.eup %1595  ;;  %v590_v19 = vadd.f32 %v2076_v41, %v589_v13  ;;  %v890_v43 = vrot.slane %v889_v28, 2 }
 0x12b   : > { %v727_v20 = vadd.f32 %v2081_v42, %v726_v14  ;;  %v1598_v21 = vpop.eup %1597  ;;  %v800_v24 = vmul.f32 %v1596_v15, %v786_v18  ;;  %v884_v42 = vrot.slane %v883_v23, 2  ;;  %v835_v58 = vadd.f32 %v834_v37, %v833_v25 }
 0x12c   : > { %v856_v27 = vmul.f32 %v1598_v21, %v786_v18  ;;  %1599 = vtanh.f32 %v590_v19  ;;  %v891_v61 = vadd.f32 %v890_v43, %v889_v28  ;;  %v875_v14 = vadd.f32 %v874_v63, %v873_v45 }
 0x12d   : > { %v838_v31 = vrot.slane %v800_v24, 4  ;;  %1601 = vtanh.f32 %v727_v20  ;;  %v885_v57 = vadd.f32 %v884_v42, %v883_v23  ;;  %v836_v9 = vrot.slane %v835_v58, 1 }
 0x12e   : > { %v894_v41 = vrot.slane %v856_v27, 4  ;;  %v892_v11 = vrot.slane %v891_v61, 1  ;;  %v825_v15 = vadd.f32 %v824_v0, %v823_v46  ;;  %v937_v18 = vsel %vm914_vm0, %v869_v60, %v863_v44 }
 0x12f   : > { %v839_v36 = vadd.f32 %v838_v31, %v800_v24  ;;  %v886_v8 = vrot.slane %v885_v57, 1  ;;  %v881_v19 = vadd.f32 %v880_v4, %v879_v50  ;;  %v831_v20 = vadd.f32 %v830_v5, %v829_v51 }
 0x130   : > { %v895_v40 = vadd.f32 %v894_v41, %v856_v27  ;;  %v837_v24 = vadd.f32 %v836_v9, %v835_v58  ;;  %v893_v26 = vadd.f32 %v892_v11, %v891_v61  ;;  %v938_v29 = vsel %vm916_vm1, %v875_v14, %v937_v18 }
 0x131   : > { %v840_v47 = vrot.slane %v839_v36, 2  ;;  %v887_v23 = vadd.f32 %v886_v8, %v885_v57  ;;  %v919_v31 = vsel %vm918_vm2, %v825_v15, %v917_v22  ;;  %v939_v41 = vsel %vm918_vm2, %v881_v19, %v938_v29 }
 0x132   : > { %v1600_v48 = vpop.eup %1599  ;;  %v896_v52 = vrot.slane %v895_v40, 2  ;;  %v921_v33 = vsel %vm920_vm3, %v831_v20, %v919_v31 }
 0x133   : > { %v1602_v54 = vpop.eup %1601  ;;  %v801_v55 = vmul.f32 %v1600_v48, %v793_v53  ;;  %v841_v59 = vadd.f32 %v840_v47, %v839_v36  ;;  %v923_v42 = vsel %vm922_vm4, %v837_v24, %v921_v33  ;;  %v940_v36 = vsel %vm920_vm3, %v887_v23, %v939_v41  ;;  %v1570_v47 = vld [vmem:[%s2156_s8] ss:$0 sm:$0xff] }
 0x134   : > { %v857_v62 = vmul.f32 %v1602_v54, %v793_v53  ;;  %v897_v2 = vadd.f32 %v896_v52, %v895_v40  ;;  %v941_v39 = vsel %vm922_vm4, %v893_v26, %v940_v36 }
 0x135   : > { %v844_v1 = vrot.slane %v801_v55, 4  ;;  %v842_v13 = vrot.slane %v841_v59, 1 }
 0x136   : > { %v900_v6 = vrot.slane %v857_v62, 4  ;;  %v898_v17 = vrot.slane %v897_v2, 1 }
 0x137   : > { %v845_v10 = vadd.f32 %v844_v1, %v801_v55  ;;  %v843_v27 = vadd.f32 %v842_v13, %v841_v59 }
 0x138   : > { %v901_v12 = vadd.f32 %v900_v6, %v857_v62  ;;  %v899_v32 = vadd.f32 %v898_v17, %v897_v2 }
 0x139   : > { %v846_v16 = vrot.slane %v845_v10, 2  ;;  %v925_v37 = vsel %vm924_vm5, %v843_v27, %v923_v42 }
 0x13a   : > { %v902_v21 = vrot.slane %v901_v12, 2  ;;  %v942_v43 = vsel %vm924_vm5, %v899_v32, %v941_v39 }
 0x13b   : > { %v847_v25 = vadd.f32 %v846_v16, %v845_v10 }
 0x13c   : > { %v903_v28 = vadd.f32 %v902_v21, %v901_v12 }
 0x13d   : > { %v848_v30 = vrot.slane %v847_v25, 1 }
 0x13e   : > { %v904_v34 = vrot.slane %v903_v28, 1 }
 0x13f   : > { %v849_v35 = vadd.f32 %v848_v30, %v847_v25 }
 0x140   : > { %v905_v38 = vadd.f32 %v904_v34, %v903_v28 }
 0x141   : > { %v927_v40 = vsel %vm926_vm6, %v849_v35, %v925_v37 }
 0x142   : > { %v945_v44 = vpack.c.bf16 %v927_v40, %v927_v40  ;;  %v943_v45 = vsel %vm926_vm6, %v905_v38, %v942_v43 }
 0x143   : > { %v946_v46 = vpack.c.bf16 %v943_v45, %v943_v45 }
 0x144   : > { %1087 = vmatmul.bf16.vlgmr.msra.gmra.mxu2 %v945_v44 }
 0x145   : > { %1100 = vmatmul.bf16.vlgmr.msra.gmra.mxu3 %v946_v46 }
 0x1c7   : > { %v1088_v48 = vpop.f32.mrf.mxu2 }
 0x1c8   : > { %v1089_v49 = vadd.f32 %v1570_v47, %v1088_v48  ;;  %v1101_v50 = vpop.f32.mrf.mxu3 }
 0x1ca   : > { %v1102_v51 = vadd.f32 %v1101_v50, %v1089_v49 }
 0x1cc   : > { %1105 = vst [vmem:[%s456_s20] sm:$0xff] %v1102_v51 }
 0x1cd   : > { %1780 = shalt.err (!%p1777_p12)
}
 0x1ce   : > { %1497 = dma.vmem_to_hbm [thread:$0]  (%p1980_p7), %s1120_s29, 128, %s1122_s15, %s1107_s13  }
 0x1cf   : > { %v1090_v52 = vpop.f32.mrf.mxu2 }
 0x1d0   : > { %v1103_v53 = vpop.f32.mrf.mxu3 }
 0x1d1 PF: > { %s1133_s28 = sand.u32 1, %s1819_s30   ;;  %p2184_p13 = scmp.ge.s32.totalorder %s1831_s12, 2 }
 0x1d2   : > { %s1134_s27 = scalar_lea.sflag [#allocation4], %s1133_s28 }
 0x1d3   : > { %p1517_p0 = pnand %p2184_p13, %p1923_p6 }
 0x1d5   : > { %p1518_p3 = pneg %p1517_p0 }
 0x1d7   : > { %1814 = dma.done.wait (%p1518_p3), %s1134_s27, 128  }
 0x1d8   : > { %1816 = vsyncadd (%p1518_p3), %s1134_s27, 4294967168  ;;  %s2185_s12 = sld [smem:[#allocation18_spill]]  ;;  %s2188_s30 = smov %s1823_s10 }
 0x1d9   : > { %s2186_s5 = sld [smem:[#allocation17_spill]] }
 0x1da   : > { %s2187_s11 = sld [smem:[#allocation19_spill]] }
 0x1de   : > { %p26_p7 = scmp.ge.s32.totalorder %s2185_s12, 4  }
 0x1df   : > { %s2189_s10 = smov %s2186_s5 }
 0x1e0   :  { %28 = sbr.rel (!%p26_p7) target bundleno = 13 (0xd), region = 129 }
 0x1e5   :  { %1140 = vsyncpa [#allocation3], 1 }
 0x1e6   :  { %1142 = vsyncpa [#allocation3 + $0x1], 1 }
 0x1e7   :  { %1143 = vsyncpa [#allocation6], 1 }
 0x1e8   :  { %1145 = vsyncpa [#allocation6 + $0x1], 1 }
 0x1e9   :  { %1146 = vsyncpa [#allocation9], 1 }
 0x1ea   :  { %1147 = vsyncpa [#allocation4], 1 }
 0x1eb   :  { %1149 = vsyncpa [#allocation4 + $0x1], 1 }

</bundles_post_ra>
